<compile_context>
chip_gen: v7x
topology: tpu7x:2x2x1
jax: 0.10.0
libtpu: 0.0.40
codegen_flags: <defaults>
</compile_context>

<pallas_src>
import functools
import math

import jax
import jax.numpy as jnp
from jax.experimental import pallas as pl
from jax.experimental.pallas import tpu as pltpu


NEG_INF = -1e30  # finite mask fill: avoids NaN rows that -inf would create


def _pick_tile(n, prefs=(256, 128, 64, 32, 16, 8)):
    """Largest preferred tile that divides n (falls back to n itself for tiny shapes)."""
    for p in prefs:
        if p <= n and n % p == 0:
            return p
    return n


# --------------------- fused QKV projection kernel --------------------------- #

def _qkv_kernel(x_ref, w_ref, b_ref, q_ref, k_ref, v_ref, *, H, D, E):
    # x_ref: (1, tm, E); w_ref: (E, 3E); b_ref: (1, 3E)
    # q_ref/v_ref: (1, H, tm, D)  (head-major, permute done here in VMEM)
    # k_ref: (1, tm, E)           (flat slab; reference's K.view(B,H,S,D) is a reshape)
    x = x_ref[0]
    y = jnp.dot(x, w_ref[...], preferred_element_type=jnp.float32) + b_ref[...]
    k_ref[0] = y[:, E:2 * E].astype(k_ref.dtype)
    for h in range(H):  # static unrolled head scatter (pure VMEM writes, no HBM pass)
        q_ref[0, h] = y[:, h * D:(h + 1) * D].astype(q_ref.dtype)
        v_ref[0, h] = y[:, 2 * E + h * D:2 * E + (h + 1) * D].astype(v_ref.dtype)


def fused_qkv_projection(x, w_qkv, b_qkv, num_heads, out_dtype=None):
    """x: (B, S, E); w_qkv: (E, 3E); b_qkv: (3E,) ->
       Q: (B, H, S, D), K: (B, S, E), V: (B, H, S, D)."""
    B, S, E = x.shape
    H = num_heads
    D = E // H
    out_dtype = out_dtype or x.dtype
    tm = _pick_tile(S)
    kernel = functools.partial(_qkv_kernel, H=H, D=D, E=E)
    # TODO(synk): for very large E, additionally tile the (E, 3E) weight over E_out.
    return pl.pallas_call(
        kernel,
        out_shape=(
            jax.ShapeDtypeStruct((B, H, S, D), out_dtype),   # Q (head-major)
            jax.ShapeDtypeStruct((B, S, E), out_dtype),      # K (flat; quirky view later)
            jax.ShapeDtypeStruct((B, H, S, D), out_dtype),   # V (head-major)
        ),
        grid_spec=pltpu.PrefetchScalarGridSpec(
            num_scalar_prefetch=0,
            grid=(B, S // tm),
            in_specs=[
                pl.BlockSpec((1, tm, E), lambda b, i: (b, i, 0)),
                pl.BlockSpec((E, 3 * E), lambda b, i: (0, 0)),
                pl.BlockSpec((1, 3 * E), lambda b, i: (0, 0)),
            ],
            out_specs=(
                pl.BlockSpec((1, H, tm, D), lambda b, i: (b, 0, i, 0)),
                pl.BlockSpec((1, tm, E), lambda b, i: (b, i, 0)),
                pl.BlockSpec((1, H, tm, D), lambda b, i: (b, 0, i, 0)),
            ),
        ),
        compiler_params=pltpu.CompilerParams(
            dimension_semantics=("parallel", "parallel")),
    )(x, w_qkv, b_qkv.reshape(1, 3 * E))


# --------------------------- output projection ------------------------------- #

def _linear_kernel(x_ref, w_ref, b_ref, o_ref):
    y = jnp.dot(x_ref[0], w_ref[...], preferred_element_type=jnp.float32) + b_ref[...]
    o_ref[0] = y.astype(o_ref.dtype)


def pallas_linear(x, w, b, out_dtype=None):
    """x: (B, S, Ein); w: (Ein, Eout); b: (Eout,) -> (B, S, Eout)."""
    B, S, Ein = x.shape
    Eout = w.shape[1]
    out_dtype = out_dtype or x.dtype
    tm = _pick_tile(S)
    tn = _pick_tile(Eout, (512, 256, 128))
    return pl.pallas_call(
        _linear_kernel,
        out_shape=jax.ShapeDtypeStruct((B, S, Eout), out_dtype),
        grid_spec=pltpu.PrefetchScalarGridSpec(
            num_scalar_prefetch=0,
            grid=(B, S // tm, Eout // tn),
            in_specs=[
                pl.BlockSpec((1, tm, Ein), lambda b, i, j: (b, i, 0)),
                pl.BlockSpec((Ein, tn), lambda b, i, j: (0, j)),
                pl.BlockSpec((1, tn), lambda b, i, j: (0, j)),
            ],
            out_specs=pl.BlockSpec((1, tm, tn), lambda b, i, j: (b, i, j)),
        ),
        compiler_params=pltpu.CompilerParams(
            dimension_semantics=("parallel", "parallel", "parallel")),
    )(x, w, b.reshape(1, Eout))


# ---------------- banded flash attention (online softmax) -------------------- #

def _kv_band_index(b, qi, kj, *, tq, tk, window, n_kv):
    # First kv tile that can intersect q tile qi's band, plus band offset kj.
    lo = jnp.maximum(0, (qi * tq - window) // tk)
    return (b, 0, jnp.minimum(lo + kj, n_kv - 1), 0)


def _flash_band_attn_kernel(q_ref, k_ref, v_ref, o_ref, m_ref, l_ref, acc_ref,
                            *, scale, window, seq_len, tq, tk, D):
    # q_ref: (1, H, tq, D); k_ref/v_ref: (1, H, tk, D); o_ref: (1, tq, H*D)
    # scratch: m_ref/l_ref (H, tq, 1) f32, acc_ref (H, tq, D) f32
    qi = pl.program_id(1)
    kj = pl.program_id(2)
    n_band = pl.num_programs(2)

    @pl.when(kj == 0)
    def _init():
        m_ref[...] = jnp.full(m_ref.shape, -jnp.inf, m_ref.dtype)
        l_ref[...] = jnp.zeros(l_ref.shape, l_ref.dtype)
        acc_ref[...] = jnp.zeros(acc_ref.shape, acc_ref.dtype)

    q = q_ref[0] * jnp.asarray(scale, q_ref.dtype)   # fold 1/sqrt(D) into Q (S*D muls)
    k = k_ref[0]
    v = v_ref[0]

    # QK^T per head on the MXU; contraction via dimension_numbers (no k.T materialized).
    s = jax.lax.dot_general(q, k, dimension_numbers=(((2,), (2,)), ((0,), (0,))),
                            preferred_element_type=jnp.float32)    # (H, tq, tk) f32

    # Sliding-window band mask generated in-kernel from iotas (no HBM mask traffic).
    q_start = qi * tq
    lo_blk = jnp.maximum(0, (q_start - window) // tk)
    kv_start = (lo_blk + kj) * tk                    # intended (unclamped) kv offset
    rows = q_start + jax.lax.broadcasted_iota(jnp.int32, (tq, tk), 0)
    cols = kv_start + jax.lax.broadcasted_iota(jnp.int32, (tq, tk), 1)
    in_band = (cols >= rows - window) & (cols < rows + window) & (cols < seq_len)
    s = jnp.where(in_band[None, :, :], s, NEG_INF)   # finite fill -> no NaN rows

    # Online softmax update (all f32).
    m_prev = m_ref[...]
    m_new = jnp.maximum(m_prev, jnp.max(s, axis=-1, keepdims=True))
    alpha = jnp.exp(m_prev - m_new)
    p = jnp.exp(s - m_new)                           # (H, tq, tk)
    l_ref[...] = alpha * l_ref[...] + jnp.sum(p, axis=-1, keepdims=True)
    acc_ref[...] = alpha * acc_ref[...] + jax.lax.dot_general(
        p.astype(v.dtype), v, dimension_numbers=(((2,), (1,)), ((0,), (0,))),
        preferred_element_type=jnp.float32)
    m_ref[...] = m_new

    @pl.when(kj == n_band - 1)
    def _finalize():
        # One per-row reciprocal (set approx=True to route it to the EUP).
        inv = pl.reciprocal(l_ref[...], approx=False)          # (H, tq, 1)
        out = acc_ref[...] * inv                               # (H, tq, D)
        H = out.shape[0]
        for h in range(H):  # static head loop; HBM store is the full E-wide block
            o_ref[0, :, h * D:(h + 1) * D] = out[h].astype(o_ref.dtype)


def sliding_window_attention(q, k, v, *, window, scale, out_dtype=jnp.float32):
    """q, k, v: (B, H, S, D) -> (B, S, H*D) with heads already concatenated on lanes."""
    B, H, S, D = q.shape
    E = H * D
    tq = _pick_tile(S)
    tk = _pick_tile(S)
    n_kv = S // tk
    # kv tiles that can intersect one q tile's band (clamped to all tiles when dense).
    n_band = min(n_kv, pl.cdiv(tq + 2 * window, tk) + 1)

    kv_index = functools.partial(_kv_band_index, tq=tq, tk=tk,
                                 window=window, n_kv=n_kv)
    kernel = functools.partial(_flash_band_attn_kernel, scale=scale, window=window,
                               seq_len=S, tq=tq, tk=tk, D=D)

    return pl.pallas_call(
        kernel,
        out_shape=jax.ShapeDtypeStruct((B, S, E), out_dtype),
        grid_spec=pltpu.PrefetchScalarGridSpec(
            num_scalar_prefetch=0,
            grid=(B, S // tq, n_band),
            in_specs=[
                pl.BlockSpec((1, H, tq, D), lambda b, qi, kj: (b, 0, qi, 0)),
                pl.BlockSpec((1, H, tk, D), kv_index),
                pl.BlockSpec((1, H, tk, D), kv_index),
            ],
            out_specs=pl.BlockSpec((1, tq, E), lambda b, qi, kj: (b, qi, 0)),
            scratch_shapes=[
                pltpu.VMEM((H, tq, 1), jnp.float32),   # running max m
                pltpu.VMEM((H, tq, 1), jnp.float32),   # running denom l
                pltpu.VMEM((H, tq, D), jnp.float32),   # running numerator acc
            ],
        ),
        compiler_params=pltpu.CompilerParams(
            dimension_semantics=("parallel", "parallel", "arbitrary")),
    )(q, k, v)


# ------------------------------ module wrapper -------------------------------- #

class SparseAttentionPallas:
    def __init__(self, embed_size, num_heads, seq_length, window_size=256,
                 sparsity_pattern='sliding_window', dropout=0.1,
                 acts_dtype=jnp.float32, key=None):
        assert embed_size % num_heads == 0
        self.embed_size = embed_size
        self.num_heads = num_heads
        self.seq_length = seq_length
        self.window_size = window_size
        self.sparsity_pattern = sparsity_pattern
        self.acts_dtype = acts_dtype   # set to jnp.bfloat16 for bf16 MXU inputs
        # effective window: anything but 'sliding_window' -> dense attention
        self.effective_window = window_size if sparsity_pattern == 'sliding_window' else seq_length

        if key is None:
            key = jax.random.PRNGKey(0)
        bound = 1.0 / math.sqrt(embed_size)
        E = embed_size
        ks = jax.random.split(key, 8)
        u = lambda k, shp: jax.random.uniform(k, shp, jnp.float32, -bound, bound)
        # weights stored as (in, out): kernels compute x @ w + b
        self.wq, self.bq = u(ks[0], (E, E)), u(ks[1], (E,))
        self.wk, self.bk = u(ks[2], (E, E)), u(ks[3], (E,))
        self.wv, self.bv = u(ks[4], (E, E)), u(ks[5], (E,))
        self.wo, self.bo = u(ks[6], (E, E)), u(ks[7], (E,))
        # fused QKV weight: x is read from HBM once for all three projections
        self.w_qkv = jnp.concatenate([self.wq, self.wk, self.wv], axis=1)   # (E, 3E)
        self.b_qkv = jnp.concatenate([self.bq, self.bk, self.bv])           # (3E,)

    def __call__(self, x):
        B, S, E = x.shape
        H = self.num_heads
        D = E // H

        # Fused QKV projection; Q/V come out head-major (B, H, S, D), K flat (B, S, E).
        q, k_flat, v = fused_qkv_projection(x, self.w_qkv, self.b_qkv, H,
                                            out_dtype=self.acts_dtype)
        # Reference quirk: K.view(B, H, S, D) WITHOUT the (0,2,1,3) permute == reshape.
        k = k_flat.reshape(B, H, S, D)

        attn = sliding_window_attention(
            q, k, v, window=self.effective_window,
            scale=1.0 / math.sqrt(D), out_dtype=x.dtype)          # (B, S, E)

        # (dropout on scores / weights is identity at inference)
        return pallas_linear(attn, self.wo, self.bo)              # (B, S, E)


# ---------------------------- pure-JAX reference ------------------------------ #

def reference_forward(mod, x):
    B, S, E = x.shape
    H, D = mod.num_heads, E // mod.num_heads
    Q = x @ mod.wq + mod.bq
    K = x @ mod.wk + mod.bk
    V = x @ mod.wv + mod.bv
    Qh = Q.reshape(B, S, H, D).transpose(0, 2, 1, 3)
    Kh = K.reshape(B, H, S, D)                      # quirky view, as in the reference
    Vh = V.reshape(B, S, H, D).transpose(0, 2, 1, 3)
    scores = jnp.einsum('bhqd,bhkd->bhqk', Qh, Kh) / math.sqrt(D)
    i = jnp.arange(S)[:, None]
    j = jnp.arange(S)[None, :]
    mask = (j >= i - mod.effective_window) & (j < i + mod.effective_window)
    scores = jnp.where(mask, scores, -jnp.inf)
    w = jax.nn.softmax(scores, axis=-1)
    out = jnp.einsum('bhqk,bhkd->bhqd', w, Vh)
    out = out.transpose(0, 2, 1, 3).reshape(B, S, E)
    return out @ mod.wo + mod.bo


# ----------------------------------- main -------------------------------------- #

if __name__ == "__main__":
    B, S, E, H = 2, 8, 32, 4
    window_size = 3   # small window so the sparsity band is non-trivial at S=8

    key = jax.random.PRNGKey(0)
    k_x, k_p = jax.random.split(key)
    x = jax.random.normal(k_x, (B, S, E), dtype=jnp.float32)

    mod = SparseAttentionPallas(embed_size=E, num_heads=H, seq_length=S,
                                window_size=window_size, key=k_p)

    out = jax.block_until_ready(mod(x))
    ref = reference_forward(mod, x)

    assert out.shape == (B, S, E)
    assert jnp.allclose(out, ref, atol=1e-4, rtol=1e-4), "mismatch vs JAX reference"

    print("KERNEL_OK")
</pallas_src>

<mosaic_0001>
module attributes {stable_mosaic.version = 11 : i64} {
  func.func @_qkv_kernel(%arg0: i32, %arg1: i32, %arg2: memref<1x8x32xf32, #tpu.memory_space<vmem>>, %arg3: memref<32x96xf32, #tpu.memory_space<vmem>>, %arg4: memref<1x96xf32, #tpu.memory_space<vmem>>, %arg5: memref<1x4x8x8xf32, #tpu.memory_space<vmem>>, %arg6: memref<1x8x32xf32, #tpu.memory_space<vmem>>, %arg7: memref<1x4x8x8xf32, #tpu.memory_space<vmem>>) attributes {dimension_semantics = [#tpu.dimension_semantics<parallel>, #tpu.dimension_semantics<parallel>], iteration_bounds = array<i64: 2, 1>, scalar_prefetch = 0 : i64, scratch_operands = 0 : i64, tpu.core_type = #tpu.core_type<tc>, window_params = [{transform_indices = @transform_0, window_bounds = array<i64: 1, 8, 32>}, {pipeline_mode = #tpu.pipeline_mode<synchronous>, transform_indices = @transform_1, window_bounds = array<i64: 32, 96>}, {pipeline_mode = #tpu.pipeline_mode<synchronous>, transform_indices = @transform_2, window_bounds = array<i64: 1, 96>}, {transform_indices = @transform_3, window_bounds = array<i64: 1, 4, 8, 8>}, {transform_indices = @transform_4, window_bounds = array<i64: 1, 8, 32>}, {transform_indices = @transform_5, window_bounds = array<i64: 1, 4, 8, 8>}]} {
    %c0 = arith.constant 0 : index
    %c0_0 = arith.constant 0 : index
    %c0_1 = arith.constant 0 : index
    %0 = vector.load %arg2[%c0, %c0_0, %c0_1] : memref<1x8x32xf32, #tpu.memory_space<vmem>>, vector<1x8x32xf32>
    %1 = vector.shape_cast %0 : vector<1x8x32xf32> to vector<8x32xf32>
    %c0_2 = arith.constant 0 : index
    %c0_3 = arith.constant 0 : index
    %2 = vector.load %arg3[%c0_2, %c0_3] : memref<32x96xf32, #tpu.memory_space<vmem>>, vector<32x96xf32>
    %cst = arith.constant dense<0.000000e+00> : vector<8x96xf32>
    %3 = tpu.matmul %1, %2, %cst {dimension_numbers = #tpu.dot_dimension_numbers<[1], [0], [0], [1], [0, 0, 1, 1], [], []>} : vector<8x32xf32>, vector<32x96xf32>, vector<8x96xf32> -> vector<8x96xf32>
    %c0_4 = arith.constant 0 : index
    %c0_5 = arith.constant 0 : index
    %4 = vector.load %arg4[%c0_4, %c0_5] : memref<1x96xf32, #tpu.memory_space<vmem>>, vector<1x96xf32>
    %5 = vector.broadcast %4 : vector<1x96xf32> to vector<8x96xf32>
    %6 = arith.addf %3, %5 : vector<8x96xf32>
    %7 = vector.extract_strided_slice %6 {offsets = [0, 32], sizes = [8, 32], strides = [1, 1]} : vector<8x96xf32> to vector<8x32xf32>
    %c0_6 = arith.constant 0 : index
    %c0_7 = arith.constant 0 : index
    %c0_8 = arith.constant 0 : index
    %8 = vector.load %arg6[%c0_6, %c0_7, %c0_8] : memref<1x8x32xf32, #tpu.memory_space<vmem>>, vector<1x8x32xf32>
    %9 = vector.shape_cast %8 : vector<1x8x32xf32> to vector<8x32xf32>
    %10 = vector.shape_cast %7 : vector<8x32xf32> to vector<1x8x32xf32>
    tpu.vector_store %arg6[%c0_6, %c0_7, %c0_8], %10 {strides = array<i32>} : memref<1x8x32xf32, #tpu.memory_space<vmem>>, vector<1x8x32xf32>,
    %11 = vector.extract_strided_slice %6 {offsets = [0, 0], sizes = [8, 8], strides = [1, 1]} : vector<8x96xf32> to vector<8x8xf32>
    %c0_9 = arith.constant 0 : index
    %c0_10 = arith.constant 0 : index
    %c0_11 = arith.constant 0 : index
    %c0_12 = arith.constant 0 : index
    %12 = vector.load %arg5[%c0_9, %c0_10, %c0_11, %c0_12] : memref<1x4x8x8xf32, #tpu.memory_space<vmem>>, vector<1x1x8x8xf32>
    %13 = vector.shape_cast %12 : vector<1x1x8x8xf32> to vector<8x8xf32>
    %14 = vector.shape_cast %11 : vector<8x8xf32> to vector<1x1x8x8xf32>
    tpu.vector_store %arg5[%c0_9, %c0_10, %c0_11, %c0_12], %14 {strides = array<i32>} : memref<1x4x8x8xf32, #tpu.memory_space<vmem>>, vector<1x1x8x8xf32>,
    %15 = vector.extract_strided_slice %6 {offsets = [0, 64], sizes = [8, 8], strides = [1, 1]} : vector<8x96xf32> to vector<8x8xf32>
    %c0_13 = arith.constant 0 : index
    %c0_14 = arith.constant 0 : index
    %c0_15 = arith.constant 0 : index
    %c0_16 = arith.constant 0 : index
    %16 = vector.load %arg7[%c0_13, %c0_14, %c0_15, %c0_16] : memref<1x4x8x8xf32, #tpu.memory_space<vmem>>, vector<1x1x8x8xf32>
    %17 = vector.shape_cast %16 : vector<1x1x8x8xf32> to vector<8x8xf32>
    %18 = vector.shape_cast %15 : vector<8x8xf32> to vector<1x1x8x8xf32>
    tpu.vector_store %arg7[%c0_13, %c0_14, %c0_15, %c0_16], %18 {strides = array<i32>} : memref<1x4x8x8xf32, #tpu.memory_space<vmem>>, vector<1x1x8x8xf32>,
    %19 = vector.extract_strided_slice %6 {offsets = [0, 8], sizes = [8, 8], strides = [1, 1]} : vector<8x96xf32> to vector<8x8xf32>
    %c0_17 = arith.constant 0 : index
    %c1 = arith.constant 1 : index
    %c0_18 = arith.constant 0 : index
    %c0_19 = arith.constant 0 : index
    %20 = vector.load %arg5[%c0_17, %c1, %c0_18, %c0_19] : memref<1x4x8x8xf32, #tpu.memory_space<vmem>>, vector<1x1x8x8xf32>
    %21 = vector.shape_cast %20 : vector<1x1x8x8xf32> to vector<8x8xf32>
    %22 = vector.shape_cast %19 : vector<8x8xf32> to vector<1x1x8x8xf32>
    tpu.vector_store %arg5[%c0_17, %c1, %c0_18, %c0_19], %22 {strides = array<i32>} : memref<1x4x8x8xf32, #tpu.memory_space<vmem>>, vector<1x1x8x8xf32>,
    %23 = vector.extract_strided_slice %6 {offsets = [0, 72], sizes = [8, 8], strides = [1, 1]} : vector<8x96xf32> to vector<8x8xf32>
    %c0_20 = arith.constant 0 : index
    %c1_21 = arith.constant 1 : index
    %c0_22 = arith.constant 0 : index
    %c0_23 = arith.constant 0 : index
    %24 = vector.load %arg7[%c0_20, %c1_21, %c0_22, %c0_23] : memref<1x4x8x8xf32, #tpu.memory_space<vmem>>, vector<1x1x8x8xf32>
    %25 = vector.shape_cast %24 : vector<1x1x8x8xf32> to vector<8x8xf32>
    %26 = vector.shape_cast %23 : vector<8x8xf32> to vector<1x1x8x8xf32>
    tpu.vector_store %arg7[%c0_20, %c1_21, %c0_22, %c0_23], %26 {strides = array<i32>} : memref<1x4x8x8xf32, #tpu.memory_space<vmem>>, vector<1x1x8x8xf32>,
    %27 = vector.extract_strided_slice %6 {offsets = [0, 16], sizes = [8, 8], strides = [1, 1]} : vector<8x96xf32> to vector<8x8xf32>
    %c0_24 = arith.constant 0 : index
    %c2 = arith.constant 2 : index
    %c0_25 = arith.constant 0 : index
    %c0_26 = arith.constant 0 : index
    %28 = vector.load %arg5[%c0_24, %c2, %c0_25, %c0_26] : memref<1x4x8x8xf32, #tpu.memory_space<vmem>>, vector<1x1x8x8xf32>
    %29 = vector.shape_cast %28 : vector<1x1x8x8xf32> to vector<8x8xf32>
    %30 = vector.shape_cast %27 : vector<8x8xf32> to vector<1x1x8x8xf32>
    tpu.vector_store %arg5[%c0_24, %c2, %c0_25, %c0_26], %30 {strides = array<i32>} : memref<1x4x8x8xf32, #tpu.memory_space<vmem>>, vector<1x1x8x8xf32>,
    %31 = vector.extract_strided_slice %6 {offsets = [0, 80], sizes = [8, 8], strides = [1, 1]} : vector<8x96xf32> to vector<8x8xf32>
    %c0_27 = arith.constant 0 : index
    %c2_28 = arith.constant 2 : index
    %c0_29 = arith.constant 0 : index
    %c0_30 = arith.constant 0 : index
    %32 = vector.load %arg7[%c0_27, %c2_28, %c0_29, %c0_30] : memref<1x4x8x8xf32, #tpu.memory_space<vmem>>, vector<1x1x8x8xf32>
    %33 = vector.shape_cast %32 : vector<1x1x8x8xf32> to vector<8x8xf32>
    %34 = vector.shape_cast %31 : vector<8x8xf32> to vector<1x1x8x8xf32>
    tpu.vector_store %arg7[%c0_27, %c2_28, %c0_29, %c0_30], %34 {strides = array<i32>} : memref<1x4x8x8xf32, #tpu.memory_space<vmem>>, vector<1x1x8x8xf32>,
    %35 = vector.extract_strided_slice %6 {offsets = [0, 24], sizes = [8, 8], strides = [1, 1]} : vector<8x96xf32> to vector<8x8xf32>
    %c0_31 = arith.constant 0 : index
    %c3 = arith.constant 3 : index
    %c0_32 = arith.constant 0 : index
    %c0_33 = arith.constant 0 : index
    %36 = vector.load %arg5[%c0_31, %c3, %c0_32, %c0_33] : memref<1x4x8x8xf32, #tpu.memory_space<vmem>>, vector<1x1x8x8xf32>
    %37 = vector.shape_cast %36 : vector<1x1x8x8xf32> to vector<8x8xf32>
    %38 = vector.shape_cast %35 : vector<8x8xf32> to vector<1x1x8x8xf32>
    tpu.vector_store %arg5[%c0_31, %c3, %c0_32, %c0_33], %38 {strides = array<i32>} : memref<1x4x8x8xf32, #tpu.memory_space<vmem>>, vector<1x1x8x8xf32>,
    %39 = vector.extract_strided_slice %6 {offsets = [0, 88], sizes = [8, 8], strides = [1, 1]} : vector<8x96xf32> to vector<8x8xf32>
    %c0_34 = arith.constant 0 : index
    %c3_35 = arith.constant 3 : index
    %c0_36 = arith.constant 0 : index
    %c0_37 = arith.constant 0 : index
    %40 = vector.load %arg7[%c0_34, %c3_35, %c0_36, %c0_37] : memref<1x4x8x8xf32, #tpu.memory_space<vmem>>, vector<1x1x8x8xf32>
    %41 = vector.shape_cast %40 : vector<1x1x8x8xf32> to vector<8x8xf32>
    %42 = vector.shape_cast %39 : vector<8x8xf32> to vector<1x1x8x8xf32>
    tpu.vector_store %arg7[%c0_34, %c3_35, %c0_36, %c0_37], %42 {strides = array<i32>} : memref<1x4x8x8xf32, #tpu.memory_space<vmem>>, vector<1x1x8x8xf32>,
    return
  }
  func.func @transform_0(%arg0: i32, %arg1: i32) -> (i32, i32, i32) {
    %c0_i32 = arith.constant 0 : i32
    %c0_i32_0 = arith.constant 0 : i32
    return %arg0, %arg1, %c0_i32 : i32, i32, i32
  }
  func.func @transform_1(%arg0: i32, %arg1: i32) -> (i32, i32) {
    %c0_i32 = arith.constant 0 : i32
    %c0_i32_0 = arith.constant 0 : i32
    %c0_i32_1 = arith.constant 0 : i32
    return %c0_i32, %c0_i32_0 : i32, i32
  }
  func.func @transform_2(%arg0: i32, %arg1: i32) -> (i32, i32) {
    %c0_i32 = arith.constant 0 : i32
    %c0_i32_0 = arith.constant 0 : i32
    %c0_i32_1 = arith.constant 0 : i32
    return %c0_i32, %c0_i32_0 : i32, i32
  }
  func.func @transform_3(%arg0: i32, %arg1: i32) -> (i32, i32, i32, i32) {
    %c0_i32 = arith.constant 0 : i32
    %c0_i32_0 = arith.constant 0 : i32
    %c0_i32_1 = arith.constant 0 : i32
    return %arg0, %c0_i32, %arg1, %c0_i32_0 : i32, i32, i32, i32
  }
  func.func @transform_4(%arg0: i32, %arg1: i32) -> (i32, i32, i32) {
    %c0_i32 = arith.constant 0 : i32
    %c0_i32_0 = arith.constant 0 : i32
    return %arg0, %arg1, %c0_i32 : i32, i32, i32
  }
  func.func @transform_5(%arg0: i32, %arg1: i32) -> (i32, i32, i32, i32) {
    %c0_i32 = arith.constant 0 : i32
    %c0_i32_0 = arith.constant 0 : i32
    %c0_i32_1 = arith.constant 0 : i32
    return %arg0, %c0_i32, %arg1, %c0_i32_0 : i32, i32, i32, i32
  }
}

</mosaic_0001>

<bundles_post_ra>
// kernel: tpu_custom_call.1
= control target key start
LH: loop header
LB: loop body
LE: loop exit
PB: predicated region body
PF: predicated region fallthrough
CT: control target
= control target key end

     0   :  { %s1357_s0 = inlined_call_operand.hbm [shape: f32[2,8,32], index: 0, kind: input, shape index: {}]   ;;  %s1358_s1 = inlined_call_operand.hbm [shape: f32[32,96], index: 1, kind: input, shape index: {}]   ;;  %s1359_s2 = inlined_call_operand.vmem [shape: f32[1,96], index: 2, kind: input, shape index: {}]   ;;  %s1360_s3 = inlined_call_operand.hbm [shape: f32[2,4,8,8], index: 3, kind: output, shape index: {0}]   ;;  %s1361_s4 = inlined_call_operand.hbm [shape: f32[2,8,32], index: 4, kind: output, shape index: {1}]   ;;  %s1362_s5 = inlined_call_operand.hbm [shape: f32[2,4,8,8], index: 5, kind: output, shape index: {2}]  }
   0x1   :  { %1368 = sst [smem:[#allocation15_spill]] %s1357_s0 }
   0x2   :  { %11 = vsyncpa [#allocation3], 0 }
   0x3   :  { %13 = vsyncpa [#allocation3 + $0x1], 0 }
   0x4   :  { %14 = vsyncpa [#allocation6], 0 }
   0x5   :  { %15 = vsyncpa [#allocation4], 0 }
   0x6   :  { %17 = vsyncpa [#allocation4 + $0x1], 0 }
   0x7   :  { %18 = vsyncpa [#allocation9], 0 }
   0x8   :  { %20 = vsyncpa [#allocation9 + $0x1], 0  ;;  %s1044_s18 = smov 0   ;;  %s1046_s19 = smov 0  }
   0x9   :  { %s1048_s20 = smov 0   ;;  %s1050_s21 = smov 0  }
   0xa   :  { %s1052_s22 = smov 0   ;;  %s1054_s23 = smov 0  }
   0xb LB: > { %s1075_s24 = sadd.s32 4294967295, %s992_s23   ;;  %s1366_s25 = sadd.s32 4294967294, %s992_s23   ;;  %s992_s23 = sphi %s1054_s23, %s26_s23   ;;  %s988_s22 = sphi %s1052_s22, %s1390_s22   ;;  %s984_s21 = sphi %s1050_s21, %s1389_s21   ;;  %s980_s20 = sphi %s1048_s20, %s1388_s20   ;;  %s976_s19 = sphi %s1046_s19, %s1387_s19   ;;  %s972_s18 = sphi %s1044_s18, %s1386_s18  }
   0xc   : > { %p60_p0 = scmp.ne.s32.totalorder %s976_s19, %s972_s18  ;;  %p1363_p1 = scmp.eq.s32.totalorder %s1075_s24, 0 }
   0xd   : > { %p134_p3 = scmp.eq.s32.totalorder %s1366_s25, 1  ;;  %p637_p5 = scmp.ge.s32.totalorder %s992_s23, 1 }
   0xe   : > { %p1086_p4 = por %p1363_p1, %p60_p0  ;;  %p197_p7 = scmp.lt.s32.totalorder %s992_s23, 3 }
   0xf   : > { %p1091_p6 = por %p134_p3, %p60_p0  ;;  %s994_s29 = smov [#allocation5]  }
  0x10   : > { %s1369_s26 = scalar_select %p1086_p4, 1, 0 }
  0x11   : > { %s1370_s27 = scalar_select %p1091_p6, 1, 0 }
  0x12   : > { %p1096_p8 = pnand %p637_p5, %p197_p7  ;;  %s209_s30 = sshll.u32 %s994_s29, 4  ;;  %s210_s30 = int_to_ptr.vmem [resolvable:$true] %s209_s30 }
  0x13   : > { %s38_s7 = sadd.s32 1, %s988_s22  ;;  %s788_s10 = scalar_lea.hbm %s1358_s1, 512 }
  0x14   : > { %s1371_s28 = scalar_select %p1096_p8, 1, 0 }
  0x15   : > { %p702_p9 = pneg %p1096_p8  ;;  %p789_p12 = scmp.ne.s32.totalorder %s1358_s1, %s788_s10 }
  0x16   : > { %p795_p5 = scmp.lt.u32.totalorder %s788_s10, %s1358_s1 }
  0x17   : > { %p1105_p11 = pnand %p702_p9, %p1363_p1 }
  0x19   : > { %p790_p13 = pneg %p1105_p11 }
  0x1b   : > { %p791_p0 = pnand %p790_p13, %p789_p12 }
  0x1d   : > { %p792_p3 = pneg %p791_p0 }
  0x1f   : > { %p797_p7 = pnand %p795_p5, %p792_p3 }
  0x21   : > { %800 = shalt.err (!%p797_p7)
}
  0x22   : > { %s801_s15 = scalar_lea.vmem %s210_s30, 512  ;;  %p809_p2 = scmp.lt.s32.totalorder %s210_s30, %s210_s30 }
  0x23   : > { %p802_p9 = scmp.ne.s32.totalorder %s210_s30, %s801_s15  ;;  %p810_p6 = scmp.lt.s32.totalorder %s801_s15, %s801_s15 }
  0x25   : > { %p804_p10 = pnand %p802_p9, %p790_p13  ;;  %p811_p4 = por %p810_p6, %p809_p2 }
  0x27   : > { %p805_p1 = pneg %p804_p10 }
  0x29   : > { %p812_p8 = pnand %p811_p4, %p805_p1 }
  0x2b   : > { %815 = shalt.err (!%p812_p8)
}
  0x2c   : > { %s995_s16 = smov 128   ;;  %s996_s17 = smov 8  }
  0x2d   : > { %705 = dma.hbm_to_vmem [thread:$0]  (!%p1105_p11), %s1358_s1, 512, %s210_s30, [#allocation6], %s995_s16, %s995_s16, %s996_s17  }
  0x2e   : > { %p40_p1 = scmp.ge.s32.totalorder %s38_s7, 2  ;;  %s47_s9 = sadd.s32 1, %s980_s20 }
  0x2f   : > { %p54_p2 = scmp.ne.s32.totalorder %s980_s20, %s976_s19  ;;  %p55_p4 = scmp.eq.s32.totalorder %s992_s23, 0 }
  0x30   : > { %s1392_s7 = smov (%p40_p1, %s38_s7), 0  ;;  %p1374_p8 = scmp.eq.s32.totalorder %s1075_s24, 1 }
  0x31   : > { %p1132_p6 = por %p55_p4, %p54_p2  ;;  %s42_s6 = ssub.s32 %s988_s22, %s1392_s7 }
  0x32   : > { %p1138_p10 = por %p1374_p8, %p54_p2  ;;  %p721_p12 = scmp.lt.s32.totalorder %s992_s23, 2 }
  0x33   : > { %p45_p11 = scmp.eq.s32.totalorder %s42_s6, 0  ;;  %s226_s30 = sand.u32 1, %s980_s20  }
  0x34   : > { %s640_s12 = sshll.u32 %s226_s30, 3  ;;  %s641_s14 = sshll.u32 %s988_s22, 7 }
  0x35   : > { %s1147_s13 = scalar_select %p45_p11, %s980_s20, %s47_s9  }
  0x36   : > { %s1376_s0 = sld [smem:[#allocation15_spill]]  ;;  %s230_s29 = scalar_lea.vmem [#allocation2], %s640_s12 }
  0x37   : > { %s238_s8 = sshll.u32 %s230_s29, 4  ;;  %p1159_p13 = pnand %p721_p12, %p1132_p6  ;;  %s1155_s8 = int_to_ptr.vmem [resolvable:$true] %s238_s8 }
  0x38   : > { %s227_s9 = scalar_lea.sflag [#allocation3], %s226_s30 }
  0x39   : > { %p818_p3 = pneg %p1159_p13 }
  0x3c   : > { %s1153_s17 = scalar_lea.hbm %s1376_s0, %s641_s14  ;;  %s821_s15 = scalar_lea.hbm %s1376_s0, 256 }
  0x3d   : > { %s816_s25 = scalar_lea.hbm %s1153_s17, 128  ;;  %p822_p9 = scmp.lt.u32.totalorder %s1153_s17, %s1376_s0 }
  0x3e   : > { %p817_p0 = scmp.ne.s32.totalorder %s1153_s17, %s816_s25  ;;  %p823_p1 = scmp.lt.u32.totalorder %s821_s15, %s816_s25 }
  0x3f   : > { %p825_p4 = scmp.lt.u32.totalorder %s816_s25, %s1153_s17 }
  0x40   : > { %p819_p5 = pnand %p818_p3, %p817_p0  ;;  %p824_p2 = por %p823_p1, %p822_p9 }
  0x42   : > { %p820_p7 = pneg %p819_p5  ;;  %p826_p6 = por %p825_p4, %p824_p2 }
  0x44   : > { %p827_p8 = pnand %p826_p6, %p820_p7 }
  0x46   : > { %830 = shalt.err (!%p827_p8)
}
  0x47   : > { %s831_s30 = scalar_lea.vmem %s1155_s8, 128  ;;  %s997_s29 = smov [#allocation2]  }
  0x48   : > { %p832_p12 = scmp.ne.s32.totalorder %s1155_s8, %s831_s30  ;;  %s836_s12 = sshll.u32 %s997_s29, 4  ;;  %s837_s12 = int_to_ptr.vmem [resolvable:$false] %s836_s12 }
  0x49   : > { %s838_s14 = scalar_lea.vmem %s837_s12, 256  ;;  %p839_p5 = scmp.lt.s32.totalorder %s1155_s8, %s837_s12 }
  0x4a   : > { %p834_p11 = pnand %p832_p12, %p818_p3  ;;  %p840_p9 = scmp.lt.s32.totalorder %s838_s14, %s831_s30 }
  0x4c   : > { %p835_p0 = pneg %p834_p11  ;;  %p841_p1 = por %p840_p9, %p839_p5 }
  0x4e   : > { %p842_p2 = pnand %p841_p1, %p835_p0 }
  0x50   : > { %845 = shalt.err (!%p842_p2)
}
  0x51   : > { %709 = dma.hbm_to_vmem [thread:$0]  (!%p1159_p13), %s1153_s17, 128, %s1155_s8, %s227_s9  }
  0x52   : > { %p1378_p7 = scmp.ne.s32.totalorder %s1371_s28, 0 }
  0x53   : > { %s1191_s25 = sand.u32 (!%p1378_p7), 1, %s976_s19   ;;  %p1379_p3 = scmp.ne.s32.totalorder (!%p1378_p7), %s1369_s26, 0 }
  0x54   : > { %247 = sbr.rel (%p1378_p7) target bundleno = 498 (0x1f2), region = 32  ;;  %s643_s15 = sshll.u32 (!%p1378_p7), %s1191_s25, 3 }
  0x55   : > { %s250_s10 = scalar_lea.sflag (!%p1378_p7), [#allocation3], %s1191_s25  ;;  %s253_s16 = scalar_lea.vmem (!%p1378_p7), [#allocation2], %s643_s15 }
  0x5b   : > { %955 = dma.done.wait (%p1379_p3), %s250_s10, 128  }
  0x5c   : > { %957 = vsyncadd (%p1379_p3), %s250_s10, 4294967168  ;;  %p1380_p13 = scmp.eq.s32.totalorder %s1075_s24, 0 }
  0x5e   : > { %959 = dma.done.wait (%p1380_p13), [#allocation6], 512   ;;  %p1381_p4 = pmov %p1380_p13 }
  0x5f   : > { %v998_v0 = vmov 0.0|0.0   ;;  %vm999_vm0 = vmmov 0   ;;  %v1000_v1 = vmov 0.0   ;;  %v295_v2 = vld [vmem:[#allocation5] sm:$0xff]  ;;  %v296_v3 = vld [vmem:[#allocation5 + $0x8] sm:$0xff]  ;;  %v297_v4 = vld [vmem:[#allocation5 + $0x10] sm:$0xff] }
  0x60   : > { %961 = vsyncadd (%p1381_p4), [#allocation6], 4294966784  ;;  %684 = vmatprep.subr.bf16.mxu0 %v998_v0  ;;  %681 = vmatprep.mubr.msk.f32.mxu0 %vm999_vm0, %v1000_v1  ;;  %v685_v5 = vpack.c.bf16 %v296_v3, %v295_v2  ;;  %v298_v6 = vld [vmem:[#allocation5 + $0x18] sm:$0xff]  ;;  %vm306_vm1 = vcmask 261120   ;;  %s1367_s26 = sshll.u32 %s1191_s25, 5  ;;  %vm385_vm2 = vcmask 64512  }
  0x61   : > { %v688_v7 = vpack.c.bf16 %v298_v6, %v297_v4  ;;  %v294_v8 = vld [vmem:[%s253_s16] sm:$0xff]  ;;  %s1001_s8 = smov 120   ;;  %s1002_s6 = smov 96  }
  0x62   : > { %686 = vmatpush3.bf16.msra.mxu0 %v685_v5  ;;  %v648_v9 = vld [vmem:[%s1359_s2] ss:$0 sm:$0xff]  ;;  %s1212_s9 = scalar_lea.vmem [#allocation7], %s1367_s26  ;;  %s1003_s30 = smov 56  }
  0x63   : > { %687 = vmatprep.subr.bf16.mxu0 %v998_v0  ;;  %s1004_s29 = smov 64   ;;  %s1005_s12 = smov 48  }
  0x64   : > { %s1006_s14 = smov 112   ;;  %s1007_s10 = smov 40  }
  0x65   : > { %s1008_s16 = smov 104   ;;  %s426_s28 = sand.u32 1, %s1075_s24  }
  0x66   : > { %689 = vmatpush3.bf16.msra.mxu0 %v688_v7  ;;  %s661_s17 = sshll.u32 %s984_s21, 7  ;;  %s1230_s24 = scalar_lea.sflag [#allocation9], %s426_s28 }
  0x67   : > { %s1009_s0 = smov [#allocation8]  }
  0x68   : > { %s850_s26 = sshll.u32 %s1009_s0, 4  ;;  %s851_s26 = int_to_ptr.vmem [resolvable:$false] %s850_s26 }
  0x69   : > { %682 = vmatmul.mubr.msk.f32.vlgmr.msra.gmra.mrb[0].mxu0 %vm306_vm1, %v294_v8 }
 0x13c   : > { %v376_v10 = vpop.f32.mrb[0].mxu0 }
 0x13d   : > { %v377_v11 = vadd.f32 %v648_v9, %v376_v10  ;;  %v683_v12 = vpop.f32.mrb[1].mxu0 }
 0x13f   : > { %391 = vrot.lane.b32.xlu1 %v377_v11, %s1001_s8  ;;  %381 = vrot.lane.b32.xlu0 %v377_v11, %s1002_s6  ;;  %386 = vst.msk [vmem:[%s1212_s9] sm:$0xff] %vm385_vm2, %v377_v11  ;;  %s286_s8 = scalar_lea.vmem [#allocation8], %s643_s15 }
 0x140   : > { %s463_s6 = sshll.u32 %s286_s8, 4  ;;  %s1225_s6 = int_to_ptr.vmem [resolvable:$true] %s463_s6 }
 0x141   : > { %s846_s15 = scalar_lea.vmem %s1225_s6, 128  ;;  %p853_p11 = scmp.lt.s32.totalorder %s1225_s6, %s851_s26 }
 0x142   : > { %p847_p6 = scmp.ne.s32.totalorder %s1225_s6, %s846_s15 }
 0x143   : > { %396 = vrot.lane.b32.xlu1 %v377_v11, %s1003_s30  ;;  %387 = vrot.lane.b32.xlu0 %v377_v11, %s1004_s29  ;;  %s1223_s30 = scalar_lea.hbm %s1361_s4, %s661_s17  ;;  %s852_s29 = scalar_lea.vmem %s851_s26, 256 }
 0x144   : > { %p848_p8 = pnand %p847_p6, %p1138_p10  ;;  %p854_p0 = scmp.lt.s32.totalorder %s852_s29, %s846_s15 }
 0x146   : > { %p849_p12 = pneg %p848_p8  ;;  %p855_p5 = por %p854_p0, %p853_p11 }
 0x147   : > { %406 = vrot.lane.b32.xlu1 %v377_v11, %s1005_s12  ;;  %401 = vrot.lane.b32.xlu0 %v377_v11, %s1006_s14 }
 0x148   : > { %p856_p9 = pnand %p855_p5, %p849_p12 }
 0x14b   : > { %416 = vrot.lane.b32.xlu1 %v377_v11, %s1007_s10  ;;  %411 = vrot.lane.b32.xlu0 %v377_v11, %s1008_s16 }
 0x1b1   : > { %v392_v13 = vpop.permute.xlu1 %391  ;;  %v382_v14 = vpop.permute.xlu0 %381 }
 0x1b2   : > { %650 = vst.msk [vmem:[%s1212_s9 + $0x8] sm:$0xff] %vm385_vm2, %v392_v13 }
 0x1b3   : > { %384 = vst.msk [vmem:[%s286_s8] sm:$0xff] %vm306_vm1, %v382_v14 }
 0x1b4   : > { %859 = shalt.err (!%p856_p9)
}
 0x1b5   : > { %s860_s12 = scalar_lea.hbm %s1223_s30, 128  ;;  %s864_s16 = scalar_lea.hbm %s1361_s4, 256 }
 0x1b6   : > { %p861_p1 = scmp.ne.s32.totalorder %s1223_s30, %s860_s12  ;;  %p865_p3 = scmp.lt.u32.totalorder %s1223_s30, %s1361_s4 }
 0x1b7   : > { %p866_p13 = scmp.lt.u32.totalorder %s864_s16, %s860_s12  ;;  %p868_p6 = scmp.lt.u32.totalorder %s860_s12, %s1223_s30 }
 0x1b8   : > { %p862_p2 = pnand %p861_p1, %p1138_p10 }
 0x1b9   : > { %p867_p4 = por %p866_p13, %p865_p3 }
 0x1ba   : > { %p863_p7 = pneg %p862_p2 }
 0x1bb   : > { %p869_p8 = por %p868_p6, %p867_p4 }
 0x1bd   : > { %p870_p12 = pnand %p869_p8, %p863_p7 }
 0x1bf   : > { %873 = shalt.err (!%p870_p12)
}
 0x1c0   : > { %697 = dma.vmem_to_hbm [thread:$0]  (%p1138_p10), %s1225_s6, 128, %s1223_s30, %s1230_s24   ;;  %v397_v15 = vpop.permute.xlu1 %396  ;;  %v388_v16 = vpop.permute.xlu0 %387 }
 0x1c1   : > { %s1382_s8 = sshll.u32 %s1191_s25, 5  ;;  %s446_s0 = sshll.u32 %s1212_s9, 4  ;;  %s1260_s0 = int_to_ptr.vmem [resolvable:$true] %s446_s0 }
 0x1c2   : > { %s293_s15 = scalar_lea.vmem [#allocation10], %s1382_s8  ;;  %s666_s26 = sshll.u32 %s984_s21, 9 }
 0x1c3   : > { %651 = vst.msk [vmem:[%s293_s15 + $0x8] sm:$0xff] %vm385_vm2, %v397_v15  ;;  %390 = vst.msk [vmem:[%s293_s15] sm:$0xff] %vm385_vm2, %v388_v16  ;;  %s477_s6 = sshll.u32 %s293_s15, 4  ;;  %s1268_s12 = scalar_lea.hbm %s1360_s3, %s666_s26  ;;  %s1270_s6 = int_to_ptr.vmem [resolvable:$true] %s477_s6 }
 0x1c4   : > { %v407_v17 = vpop.permute.xlu1 %406  ;;  %v402_v18 = vpop.permute.xlu0 %401  ;;  %s1275_s10 = scalar_lea.hbm %s1362_s5, %s666_s26  ;;  %s422_s16 = scalar_lea.sflag [#allocation4], %s1191_s25 }
 0x1c5   : > { %653 = vst.msk [vmem:[%s293_s15 + $0x10] sm:$0xff] %vm385_vm2, %v407_v17  ;;  %652 = vst.msk [vmem:[%s1212_s9 + $0x10] sm:$0xff] %vm385_vm2, %v402_v18  ;;  %s874_s28 = scalar_lea.vmem %s1260_s0, 512  ;;  %s1010_s17 = smov [#allocation7]  }
 0x1c6   : > { %p875_p11 = scmp.ne.s32.totalorder %s1260_s0, %s874_s28  ;;  %s878_s8 = sshll.u32 %s1010_s17, 4  ;;  %s879_s8 = int_to_ptr.vmem [resolvable:$false] %s878_s8 }
 0x1c7   : > { %s880_s30 = scalar_lea.vmem %s879_s8, 1024  ;;  %p881_p9 = scmp.lt.s32.totalorder %s1260_s0, %s879_s8 }
 0x1c8   : > { %v417_v19 = vpop.permute.xlu1 %416  ;;  %v412_v20 = vpop.permute.xlu0 %411  ;;  %p876_p0 = pnand %p875_p11, %p1138_p10  ;;  %p882_p1 = scmp.lt.s32.totalorder %s880_s30, %s874_s28 }
 0x1c9   : > { %655 = vst.msk [vmem:[%s293_s15 + $0x18] sm:$0xff] %vm385_vm2, %v417_v19  ;;  %654 = vst.msk [vmem:[%s1212_s9 + $0x18] sm:$0xff] %vm385_vm2, %v412_v20 }
 0x1ca   : > { %p877_p5 = pneg %p876_p0  ;;  %p883_p2 = por %p882_p1, %p881_p9 }
 0x1cc   : > { %p884_p7 = pnand %p883_p2, %p877_p5 }
 0x1ce   : > { %887 = shalt.err (!%p884_p7)
}
 0x1cf   : > { %s888_s9 = scalar_lea.hbm %s1268_s12, 512  ;;  %s892_s29 = scalar_lea.hbm %s1360_s3, 1024 }
 0x1d0   : > { %p889_p3 = scmp.ne.s32.totalorder %s1268_s12, %s888_s9  ;;  %p893_p6 = scmp.lt.u32.totalorder %s1268_s12, %s1360_s3 }
 0x1d1   : > { %p894_p8 = scmp.lt.u32.totalorder %s892_s29, %s888_s9  ;;  %p896_p11 = scmp.lt.u32.totalorder %s888_s9, %s1268_s12 }
 0x1d2   : > { %p890_p13 = pnand %p889_p3, %p1138_p10 }
 0x1d3   : > { %p895_p12 = por %p894_p8, %p893_p6 }
 0x1d4   : > { %p891_p4 = pneg %p890_p13 }
 0x1d5   : > { %p897_p0 = por %p896_p11, %p895_p12 }
 0x1d7   : > { %p898_p5 = pnand %p897_p0, %p891_p4 }
 0x1d9   : > { %901 = shalt.err (!%p898_p5)
}
 0x1da   : > { %s1011_s28 = smov 128   ;;  %s1012_s17 = smov 8  }
 0x1db   : > { %696 = dma.vmem_to_hbm [thread:$0]  (%p1138_p10), %s1260_s0, 512, %s1268_s12, %s422_s16, %s1011_s28, %s1011_s28, %s1012_s17  }
 0x1dc   : > { %s902_s8 = scalar_lea.vmem %s1270_s6, 512  ;;  %s1013_s30 = smov [#allocation10]  }
 0x1dd   : > { %p903_p9 = scmp.ne.s32.totalorder %s1270_s6, %s902_s8  ;;  %s906_s9 = sshll.u32 %s1013_s30, 4  ;;  %s907_s9 = int_to_ptr.vmem [resolvable:$false] %s906_s9 }
 0x1de   : > { %s908_s15 = scalar_lea.vmem %s907_s9, 1024  ;;  %p909_p7 = scmp.lt.s32.totalorder %s1270_s6, %s907_s9 }
 0x1df   : > { %p904_p1 = pnand %p903_p9, %p1138_p10  ;;  %p910_p3 = scmp.lt.s32.totalorder %s908_s15, %s902_s8 }
 0x1e1   : > { %p905_p2 = pneg %p904_p1  ;;  %p911_p13 = por %p910_p3, %p909_p7 }
 0x1e3   : > { %p912_p4 = pnand %p911_p13, %p905_p2 }
 0x1e5   : > { %915 = shalt.err (!%p912_p4)
}
 0x1e6   : > { %s916_s25 = scalar_lea.hbm %s1275_s10, 512  ;;  %s920_s16 = scalar_lea.hbm %s1362_s5, 1024 }
 0x1e7   : > { %p917_p6 = scmp.ne.s32.totalorder %s1275_s10, %s916_s25  ;;  %p921_p11 = scmp.lt.u32.totalorder %s1275_s10, %s1362_s5 }
 0x1e8   : > { %p922_p0 = scmp.lt.u32.totalorder %s920_s16, %s916_s25  ;;  %p924_p9 = scmp.lt.u32.totalorder %s916_s25, %s1275_s10 }
 0x1e9   : > { %p918_p8 = pnand %p917_p6, %p1138_p10 }
 0x1ea   : > { %p923_p5 = por %p922_p0, %p921_p11 }
 0x1eb   : > { %p919_p12 = pneg %p918_p8 }
 0x1ec   : > { %p925_p1 = por %p924_p9, %p923_p5 }
 0x1ee   : > { %p926_p2 = pnand %p925_p1, %p919_p12 }
 0x1f0   : > { %929 = shalt.err (!%p926_p2)
}
 0x1f1   : > { %698 = dma.vmem_to_hbm [thread:$0]  (%p1138_p10), %s1270_s6, 512, %s1275_s10, %s1230_s24, %s1011_s28, %s1011_s28, %s1012_s17  }
 0x1f2 PF: > { %s492_s21 = sand.u32 1, %s972_s18   ;;  %p1383_p7 = scmp.ne.s32.totalorder %s1370_s27, 0 }
 0x1f3   : > { %p1384_p3 = scmp.ge.s32.totalorder %s992_s23, 2  ;;  %s493_s14 = scalar_lea.sflag [#allocation4], %s492_s21 }
 0x1f5   : > { %p711_p13 = pnand %p1384_p3, %p1383_p7 }
 0x1f7   : > { %963 = dma.done.wait (!%p711_p13), %s493_s14, 512  }
 0x1f8   : > { %965 = vsyncadd (!%p711_p13), %s493_s14, 4294966784  ;;  %s1385_s11 = sadd.s32 4294967294, %s992_s23  }
 0x1f9   : > { %s501_s8 = sand.u32 1, %s1385_s11  }
 0x1fa   : > { %s502_s30 = scalar_lea.sflag [#allocation9], %s501_s8 }
 0x1fb   : > { %967 = dma.done.wait (!%p711_p13), %s502_s30, 640  }
 0x1fc   : > { %969 = vsyncadd (!%p711_p13), %s502_s30, 4294966656  ;;  %s26_s23 = sadd.s32 1, %s992_s23   ;;  %s1386_s18 = smov %s976_s19 }
 0x1fd   : > { %p23_p10 = scmp.ge.s32.totalorder %s26_s23, 4   ;;  %s1387_s19 = smov %s980_s20 }
 0x1fe   : > { %s1388_s20 = smov %s1147_s13  ;;  %s1389_s21 = smov %s988_s22 }
 0x1ff   : > { %s1390_s22 = smov %s1392_s7  ;;  %25 = sbr.rel (!%p23_p10) target bundleno = 11 (0xb), region = 119 }
 0x206   :  { %516 = vsyncpa [#allocation3], 1 }
 0x207   :  { %518 = vsyncpa [#allocation3 + $0x1], 1 }
 0x208   :  { %519 = vsyncpa [#allocation6], 1 }
 0x209   :  { %520 = vsyncpa [#allocation4], 1 }
 0x20a   :  { %522 = vsyncpa [#allocation4 + $0x1], 1 }
 0x20b   :  { %523 = vsyncpa [#allocation9], 1 }
 0x20c   :  { %525 = vsyncpa [#allocation9 + $0x1], 1 }

</bundles_post_ra>
